<compile_context>
chip_gen: v7x
topology: tpu7x:2x2x1
jax: 0.10.0
libtpu: 0.0.40
codegen_flags: <defaults>
</compile_context>

<pallas_src>
import jax
import jax.numpy as jnp
from jax.experimental import pallas as pl
from jax.experimental.pallas import tpu as pltpu


def _lambda_kernel(x_ref, o_ref):
    # func(x) = x * sigmoid(x).  Single-transcendental sigmoid:
    #   sigmoid(x) = 0.5 * tanh(0.5 * x) + 0.5   (1 EUP op + VPU mul/add)
    x = x_ref[...]
    xf = x.astype(jnp.float32)          # no-op for f32; keeps bf16 exact on v5e
    sig = 0.5 * jnp.tanh(0.5 * xf) + 0.5
    o_ref[...] = (xf * sig).astype(o_ref.dtype)


def _round_up(n: int, m: int) -> int:
    return ((n + m - 1) // m) * m


def _largest_lane_divisor(total: int, cap: int) -> int:
    """Largest multiple of 128 that divides `total`, capped at `cap`."""
    best = 0
    lane = 128
    while lane <= cap:
        if total % lane == 0:
            best = lane
        lane += 128
    return best


def lambda_layer(x,
                 *,
                 lane_width: int = 1024,
                 tile_bytes: int = 4 * 1024 * 1024,
                 min_pallas_bytes: int = 256 * 1024,
                 force_pallas: bool = False):
    """Apply LambdaLayer(func=lambda x: x * sigmoid(x)).

    Elementwise, so the NCHW tensor is re-viewed as a lane-dense (rows, L)
    slab for the Pallas kernel.  Returns an array of the same shape/dtype.
    """
    orig_shape = x.shape
    total = x.size
    itemsize = jnp.dtype(x.dtype).itemsize
    nbytes = total * itemsize

    # Fallbacks: (a) tiny tensors, where pallas_call launch overhead dominates;
    # (b) ragged totals, where a lane-dense reshape would need an HBM pad+slice
    # costing ~2 extra full passes over the data for this mem-bound op.
    if total % 128 != 0 or (not force_pallas and nbytes < min_pallas_bytes):
        xf = x.astype(jnp.float32)
        return (xf * jax.nn.sigmoid(xf)).astype(x.dtype)

    # Lane-dense, pad-free view: L divides total exactly -> free reshape.
    L = _largest_lane_divisor(total, lane_width)
    rows = total // L

    # Sublane tiling quantum: 8 for 4-byte, 16 for 2-byte, 32 for 1-byte dtypes.
    row_quantum = max(8, 32 // itemsize)

    if rows <= row_quantum:
        # Full-extent block along rows (always a legal block shape).
        tr = rows
    else:
        # ~tile_bytes per tile, as a multiple of the sublane quantum.
        tr = max(row_quantum,
                 (tile_bytes // (L * itemsize)) // row_quantum * row_quantum)
        tr = min(tr, _round_up(rows, row_quantum))
        # v7x has 2 TensorCores: keep at least 2 grid steps so the "parallel"
        # row axis can actually be sharded (also preserves DMA/compute overlap).
        if pl.cdiv(rows, tr) < 2:
            tr = max(row_quantum, _round_up(pl.cdiv(rows, 2), row_quantum))

    grid = (pl.cdiv(rows, tr),)

    x2d = x.reshape(rows, L)
    out2d = pl.pallas_call(
        _lambda_kernel,
        out_shape=jax.ShapeDtypeStruct((rows, L), x.dtype),
        grid=grid,
        in_specs=[pl.BlockSpec((tr, L), lambda i: (i, 0))],
        out_specs=pl.BlockSpec((tr, L), lambda i: (i, 0)),
        compiler_params=pltpu.CompilerParams(
            dimension_semantics=("parallel",),
            vmem_limit_bytes=40 * 1024 * 1024,
        ),
        cost_estimate=pl.CostEstimate(
            flops=3 * total,
            transcendentals=total,
            bytes_accessed=2 * total * itemsize,
        ),
    )(x2d)

    return out2d.reshape(orig_shape)


if __name__ == "__main__":
    key = jax.random.PRNGKey(0)
    x = jax.random.normal(key, (2, 4, 16, 16), dtype=jnp.float32)

    # Force the Pallas path so the kernel itself is exercised even though this
    # demo tensor is small enough that production use would hit the XLA fallback.
    out = lambda_layer(x, force_pallas=True)
    jax.block_until_ready(out)

    # Sanity check against a plain-JAX reference of the same lambda.
    ref = x * jax.nn.sigmoid(x)
    assert out.shape == x.shape and out.dtype == x.dtype
    assert jnp.max(jnp.abs(out - ref)) < 1e-5

    # Also exercise the auto path (small input -> XLA fallback).
    out2 = lambda_layer(x)
    jax.block_until_ready(out2)
    assert jnp.max(jnp.abs(out2 - ref)) < 1e-5

    print("KERNEL_OK")
</pallas_src>

<mosaic_0001>
module attributes {stable_mosaic.version = 11 : i64} {
  func.func @_lambda_kernel(%arg0: i32, %arg1: memref<2x1024xf32, #tpu.memory_space<vmem>>, %arg2: memref<2x1024xf32, #tpu.memory_space<vmem>>) attributes {dimension_semantics = [#tpu.dimension_semantics<parallel>], iteration_bounds = array<i64: 1>, scalar_prefetch = 0 : i64, scratch_operands = 0 : i64, tpu.core_type = #tpu.core_type<tc>, window_params = [{transform_indices = @transform_0, window_bounds = array<i64: 2, 1024>}, {transform_indices = @transform_1, window_bounds = array<i64: 2, 1024>}]} {
    %c0 = arith.constant 0 : index
    %c0_0 = arith.constant 0 : index
    %0 = vector.load %arg1[%c0, %c0_0] : memref<2x1024xf32, #tpu.memory_space<vmem>>, vector<2x1024xf32>
    %cst = arith.constant 5.000000e-01 : f32
    %1 = vector.broadcast %cst : f32 to vector<2x1024xf32>
    %2 = arith.mulf %1, %0 : vector<2x1024xf32>
    %3 = math.tanh %2 : vector<2x1024xf32>
    %cst_1 = arith.constant 5.000000e-01 : f32
    %4 = vector.broadcast %cst_1 : f32 to vector<2x1024xf32>
    %5 = arith.mulf %4, %3 : vector<2x1024xf32>
    %cst_2 = arith.constant 5.000000e-01 : f32
    %6 = vector.broadcast %cst_2 : f32 to vector<2x1024xf32>
    %7 = arith.addf %5, %6 : vector<2x1024xf32>
    %8 = arith.mulf %0, %7 : vector<2x1024xf32>
    %c0_3 = arith.constant 0 : index
    %c0_4 = arith.constant 0 : index
    %9 = vector.load %arg2[%c0_3, %c0_4] : memref<2x1024xf32, #tpu.memory_space<vmem>>, vector<2x1024xf32>
    tpu.vector_store %arg2[%c0_3, %c0_4], %8 {strides = array<i32>} : memref<2x1024xf32, #tpu.memory_space<vmem>>, vector<2x1024xf32>,
    return
  }
  func.func @transform_0(%arg0: i32) -> (i32, i32) {
    %c0_i32 = arith.constant 0 : i32
    %c0_i32_0 = arith.constant 0 : i32
    return %arg0, %c0_i32 : i32, i32
  }
  func.func @transform_1(%arg0: i32) -> (i32, i32) {
    %c0_i32 = arith.constant 0 : i32
    %c0_i32_0 = arith.constant 0 : i32
    return %arg0, %c0_i32 : i32, i32
  }
}

</mosaic_0001>

<bundles_post_ra>
// kernel: tpu_custom_call.1
= control target key start
LH: loop header
LB: loop body
LE: loop exit
PB: predicated region body
PF: predicated region fallthrough
CT: control target
= control target key end

     0   :  { %6 = vsyncpa [#allocation3], 0  ;;  %s140_s0 = inlined_call_operand.hbm [shape: f32[2,1024], index: 0, kind: input, shape index: {}]   ;;  %s141_s1 = inlined_call_operand.hbm [shape: f32[2,1024], index: 1, kind: output, shape index: {}]  }
   0x1   :  { %7 = vsyncpa [#allocation4], 0  ;;  %s104_s6 = smov [#allocation2]   ;;  %s56_s10 = scalar_lea.hbm %s140_s0, 256 }
   0x2   :  { %s14_s7 = sshll.u32 %s104_s6, 4  ;;  %p57_p0 = scmp.ne.s32.totalorder %s140_s0, %s56_s10  ;;  %s15_s7 = int_to_ptr.vmem [resolvable:$true] %s14_s7 }
   0x3   :  { %p60_p1 = scmp.lt.u32.totalorder %s56_s10, %s140_s0 }
   0x5   :  { %p62_p2 = pnand %p60_p1, %p57_p0 }
   0x7   :  { %65 = shalt.err (!%p62_p2)
}
   0x8   :  { %s66_s15 = scalar_lea.vmem %s15_s7, 256  ;;  %p71_p4 = scmp.lt.s32.totalorder %s15_s7, %s15_s7 }
   0x9   :  { %p67_p3 = scmp.ne.s32.totalorder %s15_s7, %s66_s15  ;;  %p72_p5 = scmp.lt.s32.totalorder %s66_s15, %s66_s15 }
   0xb   :  { %p73_p6 = por %p72_p5, %p71_p4 }
   0xd   :  { %p74_p7 = pnand %p73_p6, %p67_p3 }
   0xf   :  { %77 = shalt.err (!%p74_p7)
}
  0x10   :  { %17 = dma.hbm_to_vmem [thread:$0]  %s140_s0, 256, %s15_s7, [#allocation3]  }
  0x11   :  { %100 = dma.done.wait [#allocation3], 256  }
  0x12   :  { %101 = vsyncadd [#allocation3], 4294967040  ;;  %v21_v0 = vld [vmem:[#allocation2] sm:$0xff]  ;;  %v22_v1 = vld [vmem:[#allocation2 + $0x8] sm:$0xff]  ;;  %s105_s18 = smov [#allocation5]  }
  0x13   :  { %v23_v2 = vmul.f32 0.5, %v21_v0  ;;  %v24_v3 = vmul.f32 0.5, %v22_v1  ;;  %s41_s19 = sshll.u32 %s105_s18, 4  ;;  %s42_s19 = int_to_ptr.vmem [resolvable:$true] %s41_s19 }
  0x14   :  { %s78_s0 = scalar_lea.vmem %s42_s19, 256  ;;  %p83_p9 = scmp.lt.s32.totalorder %s42_s19, %s42_s19 }
  0x15   :  { %52 = vtanh.f32 %v23_v2  ;;  %p79_p8 = scmp.ne.s32.totalorder %s42_s19, %s78_s0  ;;  %p84_p10 = scmp.lt.s32.totalorder %s78_s0, %s78_s0 }
  0x16   :  { %54 = vtanh.f32 %v24_v3 }
  0x17   :  { %p85_p11 = por %p84_p10, %p83_p9 }
  0x19   :  { %p86_p12 = pnand %p85_p11, %p79_p8 }
  0x1f   :  { %v53_v4 = vpop.eup %52 }
  0x20   :  { %v55_v5 = vpop.eup %54  ;;  %v27_v6 = vmul.f32 0.5, %v53_v4 }
  0x21   :  { %v28_v7 = vmul.f32 0.5, %v55_v5 }
  0x22   :  { %v29_v8 = vadd.f32 0.5, %v27_v6 }
  0x23   :  { %v30_v9 = vadd.f32 0.5, %v28_v7 }
  0x24   :  { %v31_v10 = vmul.f32 %v29_v8, %v21_v0 }
  0x25   :  { %v32_v11 = vmul.f32 %v30_v9, %v22_v1 }
  0x26   :  { %33 = vst [vmem:[#allocation5] sm:$0xff] %v31_v10 }
  0x27   :  { %34 = vst [vmem:[#allocation5 + $0x8] sm:$0xff] %v32_v11 }
  0x28   :  { %89 = shalt.err (!%p86_p12)
}
  0x29   :  { %s90_s22 = scalar_lea.hbm %s141_s1, 256 }
  0x2a   :  { %p91_p13 = scmp.ne.s32.totalorder %s141_s1, %s90_s22  ;;  %p94_p0 = scmp.lt.u32.totalorder %s90_s22, %s141_s1 }
  0x2c   :  { %p96_p1 = pnand %p94_p0, %p91_p13 }
  0x2e   :  { %99 = shalt.err (!%p96_p1)
}
  0x2f   :  { %44 = dma.vmem_to_hbm [thread:$0]  %s42_s19, 256, %s141_s1, [#allocation4]  }
  0x30   :  { %102 = dma.done.wait [#allocation4], 256  }
  0x31   :  { %103 = vsyncadd [#allocation4], 4294967040 }
  0x32   :  { %48 = vsyncpa [#allocation3], 1 }
  0x33   :  { %49 = vsyncpa [#allocation4], 1 }

</bundles_post_ra>
